<compile_context>
chip_gen: v7x
topology: tpu7x:2x2x1
jax: 0.10.0
libtpu: 0.0.40
codegen_flags: <defaults>
</compile_context>

<pallas_src>
import functools

import jax
import jax.numpy as jnp
from jax.experimental import pallas as pl
from jax.experimental.pallas import tpu as pltpu


# ----------------------------------------------------------------------------
# Pallas kernel: fused matmul + bias (+ 2*sigmoid on a column sub-range)
# ----------------------------------------------------------------------------
def _matmul_bias_kernel(a_ref, w_ref, b_ref, o_ref, *, act_start, act_end):
    # bf16 operands -> MXU, f32 accumulation.
    acc = jnp.dot(a_ref[...], w_ref[...], preferred_element_type=jnp.float32)
    acc = acc + b_ref[...]
    if act_end > act_start:
        # modulator columns get 2*sigmoid(.) (EUP path, f32 elementwise).
        lane = jax.lax.broadcasted_iota(jnp.int32, acc.shape, 1)
        acc = jnp.where((lane >= act_start) & (lane < act_end),
                        2.0 * jax.nn.sigmoid(acc), acc)
    o_ref[...] = acc.astype(o_ref.dtype)


def _round_up(x, m):
    return ((x + m - 1) // m) * m


def _choose_tm(M):
    # Biggest row tile that still gives >= 2 grid steps (pipelining + both
    # v7x TensorCores busy); VMEM is never the constraint at these K/N.
    for tm in (1024, 512, 256, 128):
        if M >= 2 * tm:
            return tm
    return 128


def pallas_matmul_bias(a, w, b, act_start=0, act_end=0):
    """(M, K) @ (K, N) + b, 2*sigmoid applied to output columns [act_start, act_end).

    Operands are cast to bf16 (f32 accumulate on the MXU).  Output is computed
    lane-dense (N padded to a multiple of 128 with zero weight/bias columns)
    and sliced back to (M, N) float32 here.
    """
    M, K = a.shape
    N = w.shape[1]

    tm = _choose_tm(M)
    Mp = _round_up(M, tm)
    Np = _round_up(max(N, 128), 128)

    a_p = a.astype(jnp.bfloat16)
    if Mp != M:
        a_p = jnp.pad(a_p, ((0, Mp - M), (0, 0)))          # zero rows -> sliced off
    w_p = jnp.pad(w.astype(jnp.bfloat16), ((0, 0), (0, Np - N)))
    b_p = jnp.pad(b.astype(jnp.float32), (0, Np - N)).reshape(1, Np)

    kernel = functools.partial(_matmul_bias_kernel,
                               act_start=act_start, act_end=act_end)
    cost = pl.CostEstimate(
        flops=2 * Mp * K * Np,
        transcendentals=Mp * max(act_end - act_start, 0),
        bytes_accessed=a_p.size * 2 + w_p.size * 2 + b_p.size * 4 + Mp * Np * 4,
    )

    out = pl.pallas_call(
        kernel,
        out_shape=jax.ShapeDtypeStruct((Mp, Np), jnp.float32),
        grid=(Mp // tm,),
        in_specs=[
            pl.BlockSpec((tm, K), lambda i: (i, 0)),
            pl.BlockSpec((K, Np), lambda i: (0, 0)),
            pl.BlockSpec((1, Np), lambda i: (0, 0)),
        ],
        out_specs=pl.BlockSpec((tm, Np), lambda i: (i, 0)),
        compiler_params=pltpu.CompilerParams(dimension_semantics=("parallel",)),
        cost_estimate=cost,
    )(a_p, w_p, b_p)
    return out[:M, :N]


def _jnp_matmul_bias(a, w, b, act_start=0, act_end=0):
    """Pure-JAX reference for the Pallas kernel (same bf16/f32 precision)."""
    acc = jnp.dot(a.astype(jnp.bfloat16), w.astype(jnp.bfloat16),
                  preferred_element_type=jnp.float32)
    acc = acc + b.reshape(1, -1).astype(jnp.float32)
    if act_end > act_start:
        col = jnp.arange(acc.shape[1])[None, :]
        acc = jnp.where((col >= act_start) & (col < act_end),
                        2.0 * jax.nn.sigmoid(acc), acc)
    return acc


# ----------------------------------------------------------------------------
# Glue (channel-last): im2col and deformable (bilinear) sampling
# ----------------------------------------------------------------------------
def im2col_nhwc(x_nhwc, K, stride, pad, dil):
    """x: (B, H, W, C) -> columns (B*Ho*Wo, K*K*C) tap-major, plus (Ho, Wo)."""
    B, H, W, C = x_nhwc.shape
    Ho = (H + 2 * pad - dil * (K - 1) - 1) // stride + 1
    Wo = (W + 2 * pad - dil * (K - 1) - 1) // stride + 1
    xp = jnp.pad(x_nhwc, ((0, 0), (pad, pad), (pad, pad), (0, 0)))
    patches = []
    for kh in range(K):
        for kw in range(K):
            patches.append(xp[:, kh * dil: kh * dil + stride * Ho: stride,
                              kw * dil: kw * dil + stride * Wo: stride, :])
    cols = jnp.stack(patches, axis=3)                       # (B, Ho, Wo, KK, C)
    return cols.reshape(B * Ho * Wo, K * K * C), Ho, Wo


# TODO(synk): the data-dependent 4-corner bilinear gather has no clean Pallas/TPU
# lowering (dynamic gather); it stays in plain JAX.  Fusing sampling + modulation
# + the final matmul into one kernel (image resident in VMEM, in-kernel gather)
# would remove the dcols HBM round-trip and is the remaining big win.
def deform_columns_nhwc(x_nhwc, offset, mask, K, stride, pad, dil, Ho, Wo):
    """Modulated deformable im2col columns, channel-last in/out.

    x_nhwc: (B, H, W, C); offset: (B, Ho, Wo, 2*KK) ordered (dy, dx) per tap
    (torchvision convention); mask: (B, Ho, Wo, KK).
    Returns (B*Ho*Wo, KK*C) with tap-major ordering (matches im2col_nhwc).
    """
    B, H, W, C = x_nhwc.shape
    KK = K * K
    off = offset.reshape(B, Ho, Wo, KK, 2)
    off_y = off[..., 0]
    off_x = off[..., 1]

    ky = (jnp.arange(KK) // K).astype(jnp.float32) * dil
    kx = (jnp.arange(KK) % K).astype(jnp.float32) * dil
    base_y = (jnp.arange(Ho, dtype=jnp.float32) * stride - pad)[:, None, None] \
        + ky[None, None, :]                                 # (Ho, 1, KK)
    base_x = (jnp.arange(Wo, dtype=jnp.float32) * stride - pad)[None, :, None] \
        + kx[None, None, :]                                 # (1, Wo, KK)

    y = base_y[None] + off_y                                # (B, Ho, Wo, KK)
    xs = base_x[None] + off_x                               # (B, Ho, Wo, KK)

    y0 = jnp.floor(y)
    x0 = jnp.floor(xs)
    wy1 = y - y0
    wy0 = 1.0 - wy1
    wx1 = xs - x0
    wx0 = 1.0 - wx1

    img_flat = x_nhwc.reshape(B, H * W, C)

    def corner(yc, xc):
        valid = (yc >= 0) & (yc < H) & (xc >= 0) & (xc < W)
        yi = jnp.clip(yc, 0, H - 1).astype(jnp.int32)
        xi = jnp.clip(xc, 0, W - 1).astype(jnp.int32)
        idx = (yi * W + xi).reshape(B, -1)                  # (B, Ho*Wo*KK)

        def gather_one(fb, ib):                             # (HW, C), (n,) -> (n, C)
            return jnp.take(fb, ib, axis=0)

        vals = jax.vmap(gather_one)(img_flat, idx)          # (B, Ho*Wo*KK, C)
        vals = vals.reshape(B, Ho, Wo, KK, C)
        return vals * valid[..., None].astype(vals.dtype)

    v00 = corner(y0, x0)
    v01 = corner(y0, x0 + 1.0)
    v10 = corner(y0 + 1.0, x0)
    v11 = corner(y0 + 1.0, x0 + 1.0)

    samp = (v00 * (wy0 * wx0)[..., None] + v01 * (wy0 * wx1)[..., None]
            + v10 * (wy1 * wx0)[..., None] + v11 * (wy1 * wx1)[..., None])
    samp = samp * mask[..., None]                           # modulator
    return samp.reshape(B * Ho * Wo, KK * C)


# ----------------------------------------------------------------------------
# Forward pass (jit-compiled; use_pallas toggles the reference path)
# ----------------------------------------------------------------------------
@functools.partial(jax.jit,
                   static_argnames=("K", "stride", "padding", "dilation", "use_pallas"))
def deformable_conv2d_forward(x, w_offmod, b_offmod, w_reg, b_reg, *,
                              K, stride, padding, dilation, use_pallas=True):
    matmul_fn = pallas_matmul_bias if use_pallas else _jnp_matmul_bias
    B = x.shape[0]
    KK = K * K
    F = w_reg.shape[1]

    x_nhwc = jnp.transpose(x, (0, 2, 3, 1))                 # channel-last end-to-end
    cols, Ho, Wo = im2col_nhwc(x_nhwc, K, stride, padding, dilation)

    # offset_conv(x) and 2*sigmoid(modulator_conv(x)) fused into ONE matmul;
    # the sigmoid is applied inside the kernel to the last KK columns.
    om = matmul_fn(cols, w_offmod, b_offmod, act_start=2 * KK, act_end=3 * KK)
    offset = om[:, :2 * KK].reshape(B, Ho, Wo, 2 * KK)
    modulator = om[:, 2 * KK:3 * KK].reshape(B, Ho, Wo, KK)

    # deform_conv2d(input=x, offset, weight, mask=modulator, ...)
    dcols = deform_columns_nhwc(x_nhwc, offset, modulator, K, stride, padding,
                                dilation, Ho, Wo)
    out_flat = matmul_fn(dcols, w_reg, b_reg)               # (M, F)
    out = out_flat.reshape(B, Ho, Wo, F).transpose(0, 3, 1, 2)   # -> NCHW
    return out


# ----------------------------------------------------------------------------
# DeformableConv2d module
# ----------------------------------------------------------------------------
def _torch_weight_to_cols(w):
    """(O, C, kh, kw) PyTorch conv weight -> (KK*C, O) tap-major column matrix."""
    O, C, kh, kw = w.shape
    return w.transpose(0, 2, 3, 1).reshape(O, kh * kw * C).T


class DeformableConv2dPallas:
    def __init__(self, in_channels, out_channels, kernel_size=3, stride=1,
                 padding=1, dilation=1, bias=False, *, key):
        assert isinstance(kernel_size, int)
        self.C = in_channels
        self.F = out_channels
        self.K = kernel_size
        self.stride = stride
        self.padding = padding
        self.dilation = dilation
        KK = kernel_size * kernel_size

        k1, k2, k3, k4, k5 = jax.random.split(key, 5)
        # NOTE: the original module zero-inits offset_conv / modulator_conv.
        # Small random values are used instead so the deformable-sampling path
        # is exercised; forward-pass semantics are identical for any weights.
        w_off = 0.1 * jax.random.normal(k1, (2 * KK, in_channels, self.K, self.K), jnp.float32)
        b_off = 0.1 * jax.random.normal(k2, (2 * KK,), jnp.float32)
        w_mod = 0.1 * jax.random.normal(k3, (KK, in_channels, self.K, self.K), jnp.float32)
        b_mod = 0.1 * jax.random.normal(k4, (KK,), jnp.float32)
        w_reg = 0.1 * jax.random.normal(k5, (out_channels, in_channels, self.K, self.K), jnp.float32)

        # Fused offset+modulator weight: (KK*C, 3*KK); modulator cols are last KK.
        self.w_offmod = _torch_weight_to_cols(jnp.concatenate([w_off, w_mod], axis=0))
        self.b_offmod = jnp.concatenate([b_off, b_mod])
        self.w_reg = _torch_weight_to_cols(w_reg)            # (KK*C, F)
        self.b_reg = jnp.zeros((out_channels,), jnp.float32)  # bias=False default

    def forward(self, x, use_pallas=True):
        return deformable_conv2d_forward(
            x, self.w_offmod, self.b_offmod, self.w_reg, self.b_reg,
            K=self.K, stride=self.stride, padding=self.padding,
            dilation=self.dilation, use_pallas=use_pallas)


if __name__ == "__main__":
    key = jax.random.PRNGKey(0)
    kx, kp = jax.random.split(key)

    B, C, H, W = 2, 4, 16, 16
    F = 8
    x = jax.random.normal(kx, (B, C, H, W), dtype=jnp.float32)

    model = DeformableConv2dPallas(C, F, kernel_size=3, stride=1, padding=1,
                                   dilation=1, bias=False, key=kp)

    out = jax.block_until_ready(model.forward(x))                    # Pallas path
    ref = jax.block_until_ready(model.forward(x, use_pallas=False))  # pure-JAX ref

    assert out.shape == (B, F, H, W), out.shape
    assert bool(jnp.all(jnp.isfinite(out)))
    max_err = float(jnp.max(jnp.abs(out - ref)))
    assert jnp.allclose(out, ref, atol=1e-2, rtol=1e-2), max_err
    print("KERNEL_OK")
</pallas_src>

<mosaic_0001>
module attributes {stable_mosaic.version = 11 : i64} {
  func.func @_matmul_bias_kernel(%arg0: i32, %arg1: memref<256x36xbf16, #tpu.memory_space<vmem>>, %arg2: memref<36x128xbf16, #tpu.memory_space<vmem>>, %arg3: memref<1x128xf32, #tpu.memory_space<vmem>>, %arg4: memref<256x128xf32, #tpu.memory_space<vmem>>) attributes {dimension_semantics = [#tpu.dimension_semantics<parallel>], iteration_bounds = array<i64: 2>, scalar_prefetch = 0 : i64, scratch_operands = 0 : i64, tpu.core_type = #tpu.core_type<tc>, window_params = [{transform_indices = @transform_0, window_bounds = array<i64: 256, 36>}, {pipeline_mode = #tpu.pipeline_mode<synchronous>, transform_indices = @transform_1, window_bounds = array<i64: 36, 128>}, {pipeline_mode = #tpu.pipeline_mode<synchronous>, transform_indices = @transform_2, window_bounds = array<i64: 1, 128>}, {transform_indices = @transform_3, window_bounds = array<i64: 256, 128>}]} {
    %c0 = arith.constant 0 : index
    %c0_0 = arith.constant 0 : index
    %0 = vector.load %arg1[%c0, %c0_0] : memref<256x36xbf16, #tpu.memory_space<vmem>>, vector<256x36xbf16>
    %c0_1 = arith.constant 0 : index
    %c0_2 = arith.constant 0 : index
    %1 = vector.load %arg2[%c0_1, %c0_2] : memref<36x128xbf16, #tpu.memory_space<vmem>>, vector<36x128xbf16>
    %cst = arith.constant dense<0.000000e+00> : vector<256x128xf32>
    %2 = tpu.matmul %0, %1, %cst {dimension_numbers = #tpu.dot_dimension_numbers<[1], [0], [0], [1], [0, 0, 1, 1], [], []>} : vector<256x36xbf16>, vector<36x128xbf16>, vector<256x128xf32> -> vector<256x128xf32>
    %c0_3 = arith.constant 0 : index
    %c0_4 = arith.constant 0 : index
    %3 = vector.load %arg3[%c0_3, %c0_4] : memref<1x128xf32, #tpu.memory_space<vmem>>, vector<1x128xf32>
    %4 = vector.broadcast %3 : vector<1x128xf32> to vector<256x128xf32>
    %5 = arith.addf %2, %4 : vector<256x128xf32>
    %6 = tpu.iota {dimensions = array<i32: 1>} : vector<256x128xi32>
    %c18_i32 = arith.constant 18 : i32
    %7 = vector.broadcast %c18_i32 : i32 to vector<256x128xi32>
    %8 = arith.cmpi sge, %6, %7 : vector<256x128xi32>
    %c27_i32 = arith.constant 27 : i32
    %9 = vector.broadcast %c27_i32 : i32 to vector<256x128xi32>
    %10 = arith.cmpi slt, %6, %9 : vector<256x128xi32>
    %11 = arith.andi %8, %10 : vector<256x128xi1>
    %12 = arith.negf %5 : vector<256x128xf32>
    %13 = math.exp %12 : vector<256x128xf32>
    %cst_5 = arith.constant 1.000000e+00 : f32
    %14 = vector.broadcast %cst_5 : f32 to vector<256x128xf32>
    %15 = arith.addf %14, %13 : vector<256x128xf32>
    %16 = arith.divf %14, %15 : vector<256x128xf32>
    %cst_6 = arith.constant 2.000000e+00 : f32
    %17 = vector.broadcast %cst_6 : f32 to vector<256x128xf32>
    %18 = arith.mulf %17, %16 : vector<256x128xf32>
    %19 = arith.select %11, %18, %5 : vector<256x128xi1>, vector<256x128xf32>
    %c0_7 = arith.constant 0 : index
    %c0_8 = arith.constant 0 : index
    %20 = vector.load %arg4[%c0_7, %c0_8] : memref<256x128xf32, #tpu.memory_space<vmem>>, vector<256x128xf32>
    tpu.vector_store %arg4[%c0_7, %c0_8], %19 {strides = array<i32>} : memref<256x128xf32, #tpu.memory_space<vmem>>, vector<256x128xf32>,
    return
  }
  func.func @transform_0(%arg0: i32) -> (i32, i32) {
    %c0_i32 = arith.constant 0 : i32
    %c0_i32_0 = arith.constant 0 : i32
    return %arg0, %c0_i32 : i32, i32
  }
  func.func @transform_1(%arg0: i32) -> (i32, i32) {
    %c0_i32 = arith.constant 0 : i32
    %c0_i32_0 = arith.constant 0 : i32
    %c0_i32_1 = arith.constant 0 : i32
    return %c0_i32, %c0_i32_0 : i32, i32
  }
  func.func @transform_2(%arg0: i32) -> (i32, i32) {
    %c0_i32 = arith.constant 0 : i32
    %c0_i32_0 = arith.constant 0 : i32
    %c0_i32_1 = arith.constant 0 : i32
    return %c0_i32, %c0_i32_0 : i32, i32
  }
  func.func @transform_3(%arg0: i32) -> (i32, i32) {
    %c0_i32 = arith.constant 0 : i32
    %c0_i32_0 = arith.constant 0 : i32
    return %arg0, %c0_i32 : i32, i32
  }
}

module attributes {stable_mosaic.version = 11 : i64} {
  func.func @_matmul_bias_kernel(%arg0: i32, %arg1: memref<256x36xbf16, #tpu.memory_space<vmem>>, %arg2: memref<36x128xbf16, #tpu.memory_space<vmem>>, %arg3: memref<1x128xf32, #tpu.memory_space<vmem>>, %arg4: memref<256x128xf32, #tpu.memory_space<vmem>>) attributes {dimension_semantics = [#tpu.dimension_semantics<parallel>], iteration_bounds = array<i64: 2>, scalar_prefetch = 0 : i64, scratch_operands = 0 : i64, tpu.core_type = #tpu.core_type<tc>, window_params = [{transform_indices = @transform_0, window_bounds = array<i64: 256, 36>}, {pipeline_mode = #tpu.pipeline_mode<synchronous>, transform_indices = @transform_1, window_bounds = array<i64: 36, 128>}, {pipeline_mode = #tpu.pipeline_mode<synchronous>, transform_indices = @transform_2, window_bounds = array<i64: 1, 128>}, {transform_indices = @transform_3, window_bounds = array<i64: 256, 128>}]} {
    %c0 = arith.constant 0 : index
    %c0_0 = arith.constant 0 : index
    %0 = vector.load %arg1[%c0, %c0_0] : memref<256x36xbf16, #tpu.memory_space<vmem>>, vector<256x36xbf16>
    %c0_1 = arith.constant 0 : index
    %c0_2 = arith.constant 0 : index
    %1 = vector.load %arg2[%c0_1, %c0_2] : memref<36x128xbf16, #tpu.memory_space<vmem>>, vector<36x128xbf16>
    %cst = arith.constant dense<0.000000e+00> : vector<256x128xf32>
    %2 = tpu.matmul %0, %1, %cst {dimension_numbers = #tpu.dot_dimension_numbers<[1], [0], [0], [1], [0, 0, 1, 1], [], []>} : vector<256x36xbf16>, vector<36x128xbf16>, vector<256x128xf32> -> vector<256x128xf32>
    %c0_3 = arith.constant 0 : index
    %c0_4 = arith.constant 0 : index
    %3 = vector.load %arg3[%c0_3, %c0_4] : memref<1x128xf32, #tpu.memory_space<vmem>>, vector<1x128xf32>
    %4 = vector.broadcast %3 : vector<1x128xf32> to vector<256x128xf32>
    %5 = arith.addf %2, %4 : vector<256x128xf32>
    %c0_5 = arith.constant 0 : index
    %c0_6 = arith.constant 0 : index
    %6 = vector.load %arg4[%c0_5, %c0_6] : memref<256x128xf32, #tpu.memory_space<vmem>>, vector<256x128xf32>
    tpu.vector_store %arg4[%c0_5, %c0_6], %5 {strides = array<i32>} : memref<256x128xf32, #tpu.memory_space<vmem>>, vector<256x128xf32>,
    return
  }
  func.func @transform_0(%arg0: i32) -> (i32, i32) {
    %c0_i32 = arith.constant 0 : i32
    %c0_i32_0 = arith.constant 0 : i32
    return %arg0, %c0_i32 : i32, i32
  }
  func.func @transform_1(%arg0: i32) -> (i32, i32) {
    %c0_i32 = arith.constant 0 : i32
    %c0_i32_0 = arith.constant 0 : i32
    %c0_i32_1 = arith.constant 0 : i32
    return %c0_i32, %c0_i32_0 : i32, i32
  }
  func.func @transform_2(%arg0: i32) -> (i32, i32) {
    %c0_i32 = arith.constant 0 : i32
    %c0_i32_0 = arith.constant 0 : i32
    %c0_i32_1 = arith.constant 0 : i32
    return %c0_i32, %c0_i32_0 : i32, i32
  }
  func.func @transform_3(%arg0: i32) -> (i32, i32) {
    %c0_i32 = arith.constant 0 : i32
    %c0_i32_0 = arith.constant 0 : i32
    return %arg0, %c0_i32 : i32, i32
  }
}

</mosaic_0001>

<bundles_post_ra>
// kernel: deformable_conv2d_forward.2
= control target key start
LH: loop header
LB: loop body
LE: loop exit
PB: predicated region body
PF: predicated region fallthrough
CT: control target
= control target key end

     0   :  { %s1204_s12 = smov 0   ;;  %s1564_s0 = inlined_call_operand.vmem [shape: bf16[512,36], index: 0, kind: input, shape index: {}]   ;;  %s1565_s1 = inlined_call_operand.vmem [shape: bf16[36,128], index: 1, kind: input, shape index: {}]   ;;  %s1566_s2 = inlined_call_operand.vmem [shape: f32[1,128], index: 2, kind: input, shape index: {}]   ;;  %s1567_s3 = inlined_call_operand.vmem [shape: f32[512,128], index: 3, kind: output, shape index: {}]  }
   0x1 LB: > { %s877_s13 = sadd.s32 4294967295, %s1182_s12   ;;  %p881_p0 = scmp.ge.s32.totalorder %s1182_s12, 1  ;;  %s1182_s12 = sphi %s1204_s12, %s13_s12  }
   0x2   : > { %p138_p1 = scmp.lt.s32.totalorder %s1182_s12, 3 }
   0x4   : > { %p139_p2 = pnand %p881_p0, %p138_p1 }
   0x5   : > { %v1029_v0 = vld [vmem:[%s1565_s1] sm:$0xff] (!%p139_p2)   ;;  %v1030_v1 = vld [vmem:[%s1565_s1 + $0x8] sm:$0xff] (!%p139_p2)   ;;  %s882_s18 = sshll.u32 (!%p139_p2), %s877_s13, 5  ;;  %v1031_v2 = vld [vmem:[%s1565_s1 + $0x10] ss:$0 sps:$4 sm:$0x33] (!%p139_p2)   ;;  %v528_v63 = vlaneseq (!%p139_p2) }
   0x6   : > { %142 = sbr.rel (%p139_p2) target bundleno = 321 (0x141), region = 32  ;;  %975 = vmatprep.subr.bf16.mxu0 (!%p139_p2), %v1029_v0  ;;  %1013 = vmatprep.subr.bf16.mxu1 (!%p139_p2), %v1029_v0  ;;  %p163_p3 = scmp.lt.s32.totalorder (!%p139_p2), %s882_s18, 63  ;;  %vm363_vm0 = vcmask (!%p139_p2), 1041408   ;;  %vm314_vm1 = vcmask (!%p139_p2), 293888   ;;  %v1264_v20 = vld [vmem:[%s1566_s2] ss:$0 sm:$0xff] (!%p139_p2) }
   0x7   : > { %976 = vmatpush3.bf16.msra.mxu0 (!%p139_p2), %v1029_v0  ;;  %1016 = vmatpush3.bf16.msra.mxu1 (!%p139_p2), %v1029_v0  ;;  %v365_v3 = vsel (!%p139_p2), %vm363_vm0, %v1031_v2, 0 }
   0x8   : > { %977 = vmatprep.subr.bf16.mxu0 (!%p139_p2), %v1030_v1  ;;  %1014 = vmatprep.subr.bf16.mxu1 (!%p139_p2), %v1030_v1 }
   0xb   : > { %978 = vmatpush3.bf16.msra.mxu0 (!%p139_p2), %v1030_v1  ;;  %1017 = vmatpush3.bf16.msra.mxu1 (!%p139_p2), %v1030_v1 }
   0xc   : > { %1019 = vmatprep.subr.msk.bf16.mxu0 (!%p139_p2), %vm363_vm0, %v1031_v2  ;;  %1020 = vmatprep.subr.msk.bf16.mxu1 (!%p139_p2), %vm363_vm0, %v1031_v2 }
   0xd   : > { %s1571_s18 = smov (!%p163_p3, %s882_s18), 63 }
   0xe   : > { %s883_s21 = sshll.u32 %s1571_s18, 2  ;;  %s885_s27 = sshll.u32 %s1571_s18, 3 }
   0xf   : > { %s1227_s24 = scalar_lea.vmem %s1564_s0, %s883_s21  ;;  %980 = vmatpush3.bf16.msra.mxu0 %v365_v3  ;;  %1018 = vmatpush3.bf16.msra.mxu1 %v365_v3  ;;  %s1375_s30 = scalar_lea.vmem %s1567_s3, %s885_s27 }
  0x10   : > { %v1032_v4 = vld [vmem:[%s1227_s24] sm:$0xff]   ;;  %v1034_v6 = vld [vmem:[%s1227_s24 + $0x8] sm:$0xff]   ;;  %v1036_v8 = vld [vmem:[%s1227_s24 + $0x10] sm:$0xff]  }
  0x11   : > { %v1033_v5 = vld [vmem:[%s1227_s24 + $0x40] sm:$0xff]   ;;  %981 = vmatprep.mubr.msk.bf16.mxu0 %vm314_vm1, %v1032_v4  ;;  %v1035_v7 = vld [vmem:[%s1227_s24 + $0x48] sm:$0xff]   ;;  %v1037_v9 = vld [vmem:[%s1227_s24 + $0x50] sm:$0xff]  }
  0x12   : > { %997 = vmatprep.mubr.msk.bf16.mxu1 %vm314_vm1, %v1033_v5  ;;  %982 = vmatmul.mubr.msk.bf16.vlgmr.msra.gmra.mrb[0].mxu0 %vm314_vm1, %v1034_v6  ;;  %v1038_v10 = vld [vmem:[%s1227_s24 + $0x18] sm:$0xff]   ;;  %v1040_v12 = vld [vmem:[%s1227_s24 + $0x20] sm:$0xff]   ;;  %v1042_v14 = vld [vmem:[%s1227_s24 + $0x28] sm:$0xff]  }
  0x13   : > { %998 = vmatmul.mubr.msk.bf16.vlgmr.msra.gmra.mrb[0].mxu1 %vm314_vm1, %v1035_v7  ;;  %985 = vmatprep.mubr.msk.bf16.mxu0 %vm314_vm1, %v1036_v8  ;;  %v1039_v11 = vld [vmem:[%s1227_s24 + $0x58] sm:$0xff]   ;;  %v1041_v13 = vld [vmem:[%s1227_s24 + $0x60] sm:$0xff]   ;;  %v1043_v15 = vld [vmem:[%s1227_s24 + $0x68] sm:$0xff]  }
  0x14   : > { %1001 = vmatprep.mubr.msk.bf16.mxu1 %vm314_vm1, %v1037_v9  ;;  %v1044_v16 = vld [vmem:[%s1227_s24 + $0x30] sm:$0xff]   ;;  %v1046_v18 = vld [vmem:[%s1227_s24 + $0x38] sm:$0xff]  }
  0x15   : > { %v1045_v17 = vld [vmem:[%s1227_s24 + $0x70] sm:$0xff]   ;;  %v1047_v19 = vld [vmem:[%s1227_s24 + $0x78] sm:$0xff]  }
  0x1a   : > { %986 = vmatmul.mubr.msk.bf16.gmra.mrb[4].mxu0 %vm314_vm1, %v1038_v10  ;;  %v529_v10 = vand.u32 127, %v528_v63 }
  0x1b   : > { %1002 = vmatmul.mubr.msk.bf16.gmra.mrb[4].mxu1 %vm314_vm1, %v1039_v11  ;;  %989 = vmatprep.mubr.msk.bf16.mxu0 %vm314_vm1, %v1040_v12 }
  0x1c   : > { %1005 = vmatprep.mubr.msk.bf16.mxu1 %vm314_vm1, %v1041_v13  ;;  %vm530_vm2 = vcmp.ge.s32.totalorder %v529_v10, 18  ;;  %vm531_vm3 = vcmp.lt.s32.totalorder %v529_v10, 27 }
  0x1d   : > { %vm1362_vm4 = vmand %vm530_vm2, %vm531_vm3 }
  0x22   : > { %990 = vmatmul.mubr.msk.bf16.gmra.mrb[8].mxu0 %vm314_vm1, %v1042_v14 }
  0x23   : > { %1006 = vmatmul.mubr.msk.bf16.gmra.mrb[8].mxu1 %vm314_vm1, %v1043_v15  ;;  %993 = vmatprep.mubr.msk.bf16.mxu0 %vm314_vm1, %v1044_v16 }
  0x24   : > { %1009 = vmatprep.mubr.msk.bf16.mxu1 %vm314_vm1, %v1045_v17 }
  0x2a   : > { %994 = vmatmul.mubr.msk.bf16.gmra.mrb[12].mxu0 %vm314_vm1, %v1046_v18 }
  0x2b   : > { %1010 = vmatmul.mubr.msk.bf16.gmra.mrb[12].mxu1 %vm314_vm1, %v1047_v19 }
  0xe5   : > { %v983_v21 = vpop.f32.mrb[0].mxu0 }
  0xe6   : > { %v999_v22 = vpop.f32.mrb[0].mxu1  ;;  %v1267_v23 = vadd.f32 %v983_v21, %v1264_v20  ;;  %v401_v25 = vpop.f32.mrb[1].mxu0 }
  0xe7   : > { %v1270_v24 = vadd.f32 %v999_v22, %v1264_v20  ;;  %v465_v26 = vpop.f32.mrb[1].mxu1  ;;  %v1273_v27 = vadd.f32 %v1264_v20, %v401_v25  ;;  %v984_v29 = vpop.f32.mrb[2].mxu0 }
  0xe8   : > { %v1276_v28 = vadd.f32 %v1264_v20, %v465_v26  ;;  %v1000_v30 = vpop.f32.mrb[2].mxu1  ;;  %v924_v31 = vmul.f32 -1.442695, %v1267_v23  ;;  %v1281_v33 = vadd.f32 %v984_v29, %v1264_v20  ;;  %v404_v35 = vpop.f32.mrb[3].mxu0 }
  0xe9   : > { %v940_v32 = vmul.f32 -1.442695, %v1270_v24  ;;  %v1284_v34 = vadd.f32 %v1000_v30, %v1264_v20  ;;  %v468_v36 = vpop.f32.mrb[3].mxu1  ;;  %v922_v37 = vmul.f32 -1.442695, %v1273_v27  ;;  %v1289_v39 = vadd.f32 %v1264_v20, %v404_v35 }
  0xea   : > { %v938_v38 = vmul.f32 -1.442695, %v1276_v28  ;;  %v1292_v40 = vadd.f32 %v1264_v20, %v468_v36  ;;  %1048 = vpow2.f32 %v924_v31  ;;  %v925_v41 = vmul.f32 -1.442695, %v1281_v33 }
  0xeb   : > { %1050 = vpow2.f32 %v940_v32  ;;  %v941_v42 = vmul.f32 -1.442695, %v1284_v34  ;;  %v923_v43 = vmul.f32 -1.442695, %v1289_v39 }
  0xec   : > { %1052 = vpow2.f32 %v922_v37  ;;  %v939_v44 = vmul.f32 -1.442695, %v1292_v40 }
  0xed   : > { %1054 = vpow2.f32 %v938_v38  ;;  %v987_v45 = vpop.f32.mrb[4].mxu0 }
  0xee   : > { %v1003_v46 = vpop.f32.mrb[4].mxu1  ;;  %1056 = vpow2.f32 %v925_v41  ;;  %v1299_v47 = vadd.f32 %v987_v45, %v1264_v20  ;;  %v417_v49 = vpop.f32.mrb[5].mxu0 }
  0xef   : > { %v1302_v48 = vadd.f32 %v1003_v46, %v1264_v20  ;;  %v481_v50 = vpop.f32.mrb[5].mxu1  ;;  %1058 = vpow2.f32 %v941_v42  ;;  %v1305_v51 = vadd.f32 %v1264_v20, %v417_v49  ;;  %v988_v53 = vpop.f32.mrb[6].mxu0 }
  0xf0   : > { %v1308_v52 = vadd.f32 %v1264_v20, %v481_v50  ;;  %v1004_v54 = vpop.f32.mrb[6].mxu1  ;;  %1060 = vpow2.f32 %v923_v43  ;;  %v928_v55 = vmul.f32 -1.442695, %v1299_v47  ;;  %v1313_v57 = vadd.f32 %v988_v53, %v1264_v20  ;;  %v420_v58 = vpop.f32.mrb[7].mxu0 }
  0xf1   : > { %v944_v56 = vmul.f32 -1.442695, %v1302_v48  ;;  %v484_v59 = vpop.f32.mrb[7].mxu1  ;;  %1062 = vpow2.f32 %v939_v44  ;;  %v926_v60 = vmul.f32 -1.442695, %v1305_v51  ;;  %v1323_v19 = vadd.f32 %v1004_v54, %v1264_v20 }
  0xf2   : > { %v942_v61 = vmul.f32 -1.442695, %v1308_v52  ;;  %1064 = vpow2.f32 %v928_v55  ;;  %v929_v62 = vmul.f32 -1.442695, %v1313_v57  ;;  %v1328_v26 = vadd.f32 %v1264_v20, %v420_v58 }
  0xf3   : > { %1066 = vpow2.f32 %v944_v56  ;;  %v1331_v31 = vadd.f32 %v1264_v20, %v484_v59  ;;  %v945_v41 = vmul.f32 -1.442695, %v1323_v19 }
  0xf4   : > { %v1049_v0 = vpop.eup %1048  ;;  %1068 = vpow2.f32 %v926_v60  ;;  %v927_v46 = vmul.f32 -1.442695, %v1328_v26 }
  0xf5   : > { %v1051_v1 = vpop.eup %1050  ;;  %v631_v2 = vadd.f32 1.0, %v1049_v0  ;;  %1070 = vpow2.f32 %v942_v61  ;;  %v991_v3 = vpop.f32.mrb[8].mxu0  ;;  %v943_v56 = vmul.f32 -1.442695, %v1331_v31 }
  0xf6   : > { %v1007_v4 = vpop.f32.mrb[8].mxu1  ;;  %v1053_v5 = vpop.eup %1052  ;;  %v647_v6 = vadd.f32 1.0, %v1051_v1  ;;  %1072 = vpow2.f32 %v929_v62  ;;  %v1334_v36 = vadd.f32 %v991_v3, %v1264_v20 }
  0xf7   : > { %v433_v7 = vpop.f32.mrb[9].mxu0  ;;  %v497_v8 = vpop.f32.mrb[9].mxu1  ;;  %1074 = vrcp.f32 %v631_v2  ;;  %v629_v11 = vadd.f32 1.0, %v1053_v5  ;;  %v1338_v42 = vadd.f32 %v1007_v4, %v1264_v20 }
  0xf8   : > { %v1055_v9 = vpop.eup %1054  ;;  %v992_v12 = vpop.f32.mrb[10].mxu0  ;;  %1076 = vrcp.f32 %v647_v6  ;;  %v1342_v49 = vadd.f32 %v1264_v20, %v433_v7  ;;  %v1349_v58 = vadd.f32 %v1264_v20, %v497_v8  ;;  %v932_v63 = vmul.f32 -1.442695, %v1334_v36 }
  0xf9   : > { %v1318_v13 = vpop.f32.mrb[10].mxu1  ;;  %v1057_v14 = vpop.eup %1056  ;;  %v645_v15 = vadd.f32 1.0, %v1055_v9  ;;  %1078 = vrcp.f32 %v629_v11  ;;  %v948_v5 = vmul.f32 -1.442695, %v1338_v42  ;;  %v1368_v6 = vadd.f32 %v992_v12, %v1264_v20 }
  0xfa   : > { %v1320_v16 = vpop.f32.mrb[11].mxu0  ;;  %v1059_v17 = vpop.eup %1058  ;;  %v632_v18 = vadd.f32 1.0, %v1057_v14  ;;  %v930_v10 = vmul.f32 -1.442695, %v1342_v49  ;;  %v1380_v11 = vadd.f32 %v1318_v13, %v1264_v20 }
  0xfb   : > { %v1325_v21 = vpop.f32.mrb[11].mxu1  ;;  %v1061_v22 = vpop.eup %1060  ;;  %1080 = vrcp.f32 %v645_v15  ;;  %v648_v25 = vadd.f32 1.0, %v1059_v17  ;;  %v946_v15 = vmul.f32 -1.442695, %v1349_v58  ;;  %v1385_v17 = vadd.f32 %v1264_v20, %v1320_v16 }
  0xfc   : > { %v1063_v29 = vpop.eup %1062  ;;  %1082 = vrcp.f32 %v632_v18  ;;  %v630_v30 = vadd.f32 1.0, %v1061_v22  ;;  %v1392_v13 = vadd.f32 %v1264_v20, %v1325_v21  ;;  %v949_v21 = vmul.f32 -1.442695, %v1380_v11 }
  0xfd   : > { %v1065_v32 = vpop.eup %1064  ;;  %1084 = vrcp.f32 %v648_v25  ;;  %v646_v35 = vadd.f32 1.0, %v1063_v29  ;;  %v995_v43 = vpop.f32.mrb[12].mxu0 }
  0xfe   : > { %v1067_v37 = vpop.eup %1066  ;;  %1086 = vrcp.f32 %v630_v30  ;;  %v635_v38 = vadd.f32 1.0, %v1065_v32  ;;  %v1011_v50 = vpop.f32.mrb[12].mxu1  ;;  %v933_v32 = vmul.f32 -1.442695, %v1368_v6 }
  0xff   : > { %v1069_v44 = vpop.eup %1068  ;;  %1088 = vrcp.f32 %v646_v35  ;;  %v651_v45 = vadd.f32 1.0, %v1067_v37  ;;  %v1344_v53 = vpop.f32.mrb[13].mxu0 }
 0x100   : > { %v1071_v54 = vpop.eup %1070  ;;  %1090 = vrcp.f32 %v635_v38  ;;  %v633_v55 = vadd.f32 1.0, %v1069_v44  ;;  %v1351_v59 = vpop.f32.mrb[13].mxu1  ;;  %v1409_v44 = vadd.f32 %v995_v43, %v1264_v20 }
 0x101   : > { %v1353_v60 = vpop.f32.mrb[14].mxu0  ;;  %v1073_v61 = vpop.eup %1072  ;;  %1092 = vrcp.f32 %v651_v45  ;;  %v649_v62 = vadd.f32 1.0, %v1071_v54  ;;  %v1416_v54 = vadd.f32 %v1011_v50, %v1264_v20  ;;  %v947_v50 = vmul.f32 -1.442695, %v1392_v13 }
 0x102   : > { %v1356_v0 = vpop.f32.mrb[14].mxu1  ;;  %v1358_v1 = vpop.f32.mrb[15].mxu0  ;;  %1094 = vrcp.f32 %v633_v55  ;;  %v636_v4 = vadd.f32 1.0, %v1073_v61 }
 0x103   : > { %v1075_v2 = vpop.eup %1074  ;;  %v1370_v7 = vpop.f32.mrb[15].mxu1  ;;  %1096 = vrcp.f32 %v649_v62 }
 0x104   : > { %v1077_v8 = vpop.eup %1076  ;;  %v727_v9 = vmul.f32 2.0, %v1075_v2  ;;  %1098 = vrcp.f32 %v636_v4  ;;  %v936_v4 = vmul.f32 -1.442695, %v1409_v44 }
 0x105   : > { %v1079_v14 = vpop.eup %1078  ;;  %v743_v12 = vmul.f32 2.0, %v1077_v8  ;;  %1100 = vpow2.f32 %v945_v41 }
 0x106   : > { %v1081_v18 = vpop.eup %1080  ;;  %v759_v22 = vsel %vm1362_vm4, %v727_v9, %v1267_v23  ;;  %v725_v25 = vmul.f32 2.0, %v1079_v14  ;;  %1102 = vpow2.f32 %v927_v46  ;;  %v952_v9 = vmul.f32 -1.442695, %v1416_v54 }
 0x107   : > { %v1083_v29 = vpop.eup %1082  ;;  %791 = vst [vmem:[%s1375_s30 + $0x10] sm:$0xff] %v759_v22  ;;  %v775_v30 = vsel %vm1362_vm4, %v743_v12, %v1270_v24  ;;  %v741_v16 = vmul.f32 2.0, %v1081_v18  ;;  %1104 = vpow2.f32 %v943_v56  ;;  %v931_v56 = vmul.f32 -1.442695, %v1385_v17 }
 0x108   : > { %v1085_v35 = vpop.eup %1084  ;;  %807 = vst [vmem:[%s1375_s30 + $0x90] sm:$0xff] %v775_v30  ;;  %v757_v23 = vsel %vm1362_vm4, %v725_v25, %v1273_v27  ;;  %v728_v37 = vmul.f32 2.0, %v1083_v29  ;;  %1106 = vpow2.f32 %v932_v63 }
 0x109   : > { %v1087_v38 = vpop.eup %1086  ;;  %789 = vst [vmem:[%s1375_s30] sm:$0xff] %v757_v23  ;;  %v773_v24 = vsel %vm1362_vm4, %v741_v16, %v1276_v28  ;;  %v744_v41 = vmul.f32 2.0, %v1085_v35  ;;  %1108 = vpow2.f32 %v948_v5 }
 0x10a   : > { %v1089_v45 = vpop.eup %1088  ;;  %805 = vst [vmem:[%s1375_s30 + $0x80] sm:$0xff] %v773_v24  ;;  %v760_v27 = vsel %vm1362_vm4, %v728_v37, %v1281_v33  ;;  %v726_v46 = vmul.f32 2.0, %v1087_v38  ;;  %1110 = vpow2.f32 %v930_v10 }
 0x10b   : > { %v1091_v55 = vpop.eup %1090  ;;  %792 = vst [vmem:[%s1375_s30 + $0x18] sm:$0xff] %v760_v27  ;;  %v776_v28 = vsel %vm1362_vm4, %v744_v41, %v1284_v34  ;;  %v742_v43 = vmul.f32 2.0, %v1089_v45  ;;  %1112 = vpow2.f32 %v946_v15  ;;  %v1457_v45 = vadd.f32 %v1264_v20, %v1344_v53 }
 0x10c   : > { %v1093_v61 = vpop.eup %1092  ;;  %808 = vst [vmem:[%s1375_s30 + $0x98] sm:$0xff] %v776_v28  ;;  %v758_v33 = vsel %vm1362_vm4, %v726_v46, %v1289_v39  ;;  %v731_v62 = vmul.f32 2.0, %v1091_v55  ;;  %1114 = vpow2.f32 %v933_v32  ;;  %v1461_v55 = vadd.f32 %v1264_v20, %v1351_v59 }
 0x10d   : > { %v1095_v63 = vpop.eup %1094  ;;  %790 = vst [vmem:[%s1375_s30 + $0x8] sm:$0xff] %v758_v33  ;;  %v774_v34 = vsel %vm1362_vm4, %v742_v43, %v1292_v40  ;;  %v747_v2 = vmul.f32 2.0, %v1093_v61  ;;  %1116 = vpow2.f32 %v949_v21  ;;  %v1469_v53 = vadd.f32 %v1356_v0, %v1264_v20 }
 0x10e   : > { %v1097_v5 = vpop.eup %1096  ;;  %806 = vst [vmem:[%s1375_s30 + $0x88] sm:$0xff] %v774_v34  ;;  %v763_v39 = vsel %vm1362_vm4, %v731_v62, %v1299_v47  ;;  %v729_v8 = vmul.f32 2.0, %v1095_v63  ;;  %1118 = vpow2.f32 %v931_v56  ;;  %v1465_v56 = vadd.f32 %v1353_v60, %v1264_v20 }
 0x10f   : > { %v1099_v10 = vpop.eup %1098  ;;  %795 = vst [vmem:[%s1375_s30 + $0x30] sm:$0xff] %v763_v39  ;;  %v779_v40 = vsel %vm1362_vm4, %v747_v2, %v1302_v48  ;;  %v745_v14 = vmul.f32 2.0, %v1097_v5  ;;  %1120 = vpow2.f32 %v947_v50  ;;  %v934_v59 = vmul.f32 -1.442695, %v1457_v45 }
 0x110   : > { %v1101_v12 = vpop.eup %1100  ;;  %811 = vst [vmem:[%s1375_s30 + $0xb0] sm:$0xff] %v779_v40  ;;  %v761_v47 = vsel %vm1362_vm4, %v729_v8, %v1305_v51  ;;  %v732_v15 = vmul.f32 2.0, %v1099_v10  ;;  %1122 = vpow2.f32 %v936_v4  ;;  %v1474_v63 = vadd.f32 %v1264_v20, %v1358_v1 }
 0x111   : > { %v1103_v18 = vpop.eup %1102  ;;  %793 = vst [vmem:[%s1375_s30 + $0x20] sm:$0xff] %v761_v47  ;;  %v777_v22 = vsel %vm1362_vm4, %v745_v14, %v1308_v52  ;;  %v652_v25 = vadd.f32 1.0, %v1101_v12  ;;  %1124 = vpow2.f32 %v952_v9  ;;  %v950_v2 = vmul.f32 -1.442695, %v1461_v55 }
 0x112   : > { %v1105_v48 = vpop.eup %1104  ;;  %809 = vst [vmem:[%s1375_s30 + $0xa0] sm:$0xff] %v777_v22  ;;  %v764_v29 = vsel %vm1362_vm4, %v732_v15, %v1313_v57  ;;  %v634_v30 = vadd.f32 1.0, %v1103_v18  ;;  %v1479_v4 = vadd.f32 %v1264_v20, %v1370_v7  ;;  %v937_v39 = vmul.f32 -1.442695, %v1465_v56 }
 0x113   : > { %v1107_v16 = vpop.eup %1106  ;;  %796 = vst [vmem:[%s1375_s30 + $0x38] sm:$0xff] %v764_v29  ;;  %1126 = vrcp.f32 %v652_v25  ;;  %v650_v51 = vadd.f32 1.0, %v1105_v48  ;;  %v953_v1 = vmul.f32 -1.442695, %v1469_v53  ;;  %v935_v20 = vmul.f32 -1.442695, %v1474_v63 }
 0x114   : > { %v1109_v32 = vpop.eup %1108  ;;  %1128 = vrcp.f32 %v634_v30  ;;  %v639_v35 = vadd.f32 1.0, %v1107_v16  ;;  %v951_v15 = vmul.f32 -1.442695, %v1479_v4 }
 0x115   : > { %v1111_v23 = vpop.eup %1110  ;;  %1130 = vrcp.f32 %v650_v51  ;;  %v655_v52 = vadd.f32 1.0, %v1109_v32 }
 0x116   : > { %v1113_v37 = vpop.eup %1112  ;;  %1132 = vrcp.f32 %v639_v35  ;;  %v637_v21 = vadd.f32 1.0, %v1111_v23 }
 0x117   : > { %v1115_v38 = vpop.eup %1114  ;;  %1134 = vrcp.f32 %v655_v52  ;;  %v653_v24 = vadd.f32 1.0, %v1113_v37 }
 0x118   : > { %v1117_v41 = vpop.eup %1116  ;;  %1136 = vrcp.f32 %v637_v21  ;;  %v640_v57 = vadd.f32 1.0, %v1115_v38 }
 0x119   : > { %v1119_v27 = vpop.eup %1118  ;;  %1138 = vrcp.f32 %v653_v24  ;;  %v656_v46 = vadd.f32 1.0, %v1117_v41 }
 0x11a   : > { %v1121_v28 = vpop.eup %1120  ;;  %1140 = vrcp.f32 %v640_v57  ;;  %v638_v43 = vadd.f32 1.0, %v1119_v27 }
 0x11b   : > { %v1123_v61 = vpop.eup %1122  ;;  %1142 = vrcp.f32 %v656_v46  ;;  %v654_v33 = vadd.f32 1.0, %v1121_v28 }
 0x11c   : > { %v1125_v62 = vpop.eup %1124  ;;  %1144 = vrcp.f32 %v638_v43  ;;  %v643_v50 = vadd.f32 1.0, %v1123_v61 }
 0x11d   : > { %v1127_v34 = vpop.eup %1126  ;;  %1146 = vrcp.f32 %v654_v33  ;;  %v659_v60 = vadd.f32 1.0, %v1125_v62 }
 0x11e   : > { %v1129_v0 = vpop.eup %1128  ;;  %v748_v5 = vmul.f32 2.0, %v1127_v34  ;;  %1148 = vrcp.f32 %v643_v50 }
 0x11f   : > { %v1131_v8 = vpop.eup %1130  ;;  %v730_v9 = vmul.f32 2.0, %v1129_v0  ;;  %1150 = vrcp.f32 %v659_v60 }
 0x120   : > { %v1133_v10 = vpop.eup %1132  ;;  %v780_v40 = vsel %vm1362_vm4, %v748_v5, %v1323_v19  ;;  %v746_v14 = vmul.f32 2.0, %v1131_v8  ;;  %1152 = vpow2.f32 %v934_v59 }
 0x121   : > { %v1135_v7 = vpop.eup %1134  ;;  %812 = vst [vmem:[%s1375_s30 + $0xb8] sm:$0xff] %v780_v40  ;;  %v762_v12 = vsel %vm1362_vm4, %v730_v9, %v1328_v26  ;;  %v735_v47 = vmul.f32 2.0, %v1133_v10  ;;  %1154 = vpow2.f32 %v950_v2 }
 0x122   : > { %v1137_v18 = vpop.eup %1136  ;;  %794 = vst [vmem:[%s1375_s30 + $0x28] sm:$0xff] %v762_v12  ;;  %v778_v19 = vsel %vm1362_vm4, %v746_v14, %v1331_v31  ;;  %v751_v22 = vmul.f32 2.0, %v1135_v7  ;;  %1156 = vpow2.f32 %v937_v39 }
 0x123   : > { %v1139_v25 = vpop.eup %1138  ;;  %810 = vst [vmem:[%s1375_s30 + $0xa8] sm:$0xff] %v778_v19  ;;  %v767_v26 = vsel %vm1362_vm4, %v735_v47, %v1334_v36  ;;  %v733_v48 = vmul.f32 2.0, %v1137_v18  ;;  %1158 = vpow2.f32 %v953_v1 }
 0x124   : > { %v1141_v29 = vpop.eup %1140  ;;  %799 = vst [vmem:[%s1375_s30 + $0x50] sm:$0xff] %v767_v26  ;;  %v783_v30 = vsel %vm1362_vm4, %v751_v22, %v1338_v42  ;;  %v749_v16 = vmul.f32 2.0, %v1139_v25  ;;  %1160 = vpow2.f32 %v935_v20 }
 0x125   : > { %v1143_v31 = vpop.eup %1142  ;;  %815 = vst [vmem:[%s1375_s30 + $0xd0] sm:$0xff] %v783_v30  ;;  %v765_v51 = vsel %vm1362_vm4, %v733_v48, %v1342_v49  ;;  %v736_v36 = vmul.f32 2.0, %v1141_v29  ;;  %1162 = vpow2.f32 %v951_v15 }
 0x126   : > { %v1145_v32 = vpop.eup %1144  ;;  %797 = vst [vmem:[%s1375_s30 + $0x40] sm:$0xff] %v765_v51  ;;  %v781_v35 = vsel %vm1362_vm4, %v749_v16, %v1349_v58  ;;  %v752_v42 = vmul.f32 2.0, %v1143_v31 }
 0x127   : > { %v1147_v23 = vpop.eup %1146  ;;  %813 = vst [vmem:[%s1375_s30 + $0xc0] sm:$0xff] %v781_v35  ;;  %v768_v52 = vsel %vm1362_vm4, %v736_v36, %v1368_v6  ;;  %v734_v37 = vmul.f32 2.0, %v1145_v32 }
 0x128   : > { %v1149_v49 = vpop.eup %1148  ;;  %800 = vst [vmem:[%s1375_s30 + $0x58] sm:$0xff] %v768_v52  ;;  %v784_v21 = vsel %vm1362_vm4, %v752_v42, %v1380_v11  ;;  %v750_v38 = vmul.f32 2.0, %v1147_v23 }
 0x129   : > { %v1151_v24 = vpop.eup %1150  ;;  %816 = vst [vmem:[%s1375_s30 + $0xd8] sm:$0xff] %v784_v21  ;;  %v766_v58 = vsel %vm1362_vm4, %v734_v37, %v1385_v17  ;;  %v739_v41 = vmul.f32 2.0, %v1149_v49 }
 0x12a   : > { %v1153_v57 = vpop.eup %1152  ;;  %798 = vst [vmem:[%s1375_s30 + $0x48] sm:$0xff] %v766_v58  ;;  %v782_v6 = vsel %vm1362_vm4, %v750_v38, %v1392_v13  ;;  %v755_v27 = vmul.f32 2.0, %v1151_v24 }
 0x12b   : > { %v1155_v46 = vpop.eup %1154  ;;  %814 = vst [vmem:[%s1375_s30 + $0xc8] sm:$0xff] %v782_v6  ;;  %v771_v11 = vsel %vm1362_vm4, %v739_v41, %v1409_v44  ;;  %v641_v28 = vadd.f32 1.0, %v1153_v57 }
 0x12c   : > { %v1157_v43 = vpop.eup %1156  ;;  %803 = vst [vmem:[%s1375_s30 + $0x70] sm:$0xff] %v771_v11  ;;  %v787_v17 = vsel %vm1362_vm4, %v755_v27, %v1416_v54  ;;  %v657_v61 = vadd.f32 1.0, %v1155_v46 }
 0x12d   : > { %v1159_v33 = vpop.eup %1158  ;;  %819 = vst [vmem:[%s1375_s30 + $0xf0] sm:$0xff] %v787_v17  ;;  %1164 = vrcp.f32 %v641_v28  ;;  %v644_v62 = vadd.f32 1.0, %v1157_v43 }
 0x12e   : > { %v1161_v13 = vpop.eup %1160  ;;  %1166 = vrcp.f32 %v657_v61  ;;  %v660_v50 = vadd.f32 1.0, %v1159_v33 }
 0x12f   : > { %v1163_v59 = vpop.eup %1162  ;;  %1168 = vrcp.f32 %v644_v62  ;;  %v642_v34 = vadd.f32 1.0, %v1161_v13 }
 0x130   : > { %1170 = vrcp.f32 %v660_v50  ;;  %v658_v44 = vadd.f32 1.0, %v1163_v59 }
 0x131   : > { %1172 = vrcp.f32 %v642_v34 }
 0x132   : > { %1174 = vrcp.f32 %v658_v44 }
 0x137   : > { %v1165_v60 = vpop.eup %1164 }
 0x138   : > { %v1167_v54 = vpop.eup %1166  ;;  %v737_v2 = vmul.f32 2.0, %v1165_v60 }
 0x139   : > { %v1169_v0 = vpop.eup %1168  ;;  %v753_v5 = vmul.f32 2.0, %v1167_v54 }
 0x13a   : > { %v1171_v39 = vpop.eup %1170  ;;  %v769_v8 = vsel %vm1362_vm4, %v737_v2, %v1457_v45  ;;  %v740_v9 = vmul.f32 2.0, %v1169_v0 }
 0x13b   : > { %v1173_v1 = vpop.eup %1172  ;;  %801 = vst [vmem:[%s1375_s30 + $0x60] sm:$0xff] %v769_v8  ;;  %v785_v10 = vsel %vm1362_vm4, %v753_v5, %v1461_v55  ;;  %v756_v40 = vmul.f32 2.0, %v1171_v39 }
 0x13c   : > { %v1175_v14 = vpop.eup %1174  ;;  %817 = vst [vmem:[%s1375_s30 + $0xe0] sm:$0xff] %v785_v10  ;;  %v772_v20 = vsel %vm1362_vm4, %v740_v9, %v1465_v56  ;;  %v738_v7 = vmul.f32 2.0, %v1173_v1 }
 0x13d   : > { %804 = vst [vmem:[%s1375_s30 + $0x78] sm:$0xff] %v772_v20  ;;  %v788_v45 = vsel %vm1362_vm4, %v756_v40, %v1469_v53  ;;  %v754_v12 = vmul.f32 2.0, %v1175_v14 }
 0x13e   : > { %820 = vst [vmem:[%s1375_s30 + $0xf8] sm:$0xff] %v788_v45  ;;  %v770_v47 = vsel %vm1362_vm4, %v738_v7, %v1474_v63 }
 0x13f   : > { %802 = vst [vmem:[%s1375_s30 + $0x68] sm:$0xff] %v770_v47  ;;  %v786_v55 = vsel %vm1362_vm4, %v754_v12, %v1479_v4 }
 0x140   : > { %818 = vst [vmem:[%s1375_s30 + $0xe8] sm:$0xff] %v786_v55 }
 0x141 PF: > { %s13_s12 = sadd.s32 1, %s1182_s12  }
 0x142   : > { %p10_p4 = scmp.ge.s32.totalorder %s13_s12, 4  }
 0x144   :  { %12 = sbr.rel (!%p10_p4) target bundleno = 1 (0x1), region = 62 }

// kernel: mul.8
= control target key start
LH: loop header
LB: loop body
LE: loop exit
PB: predicated region body
PF: predicated region fallthrough
CT: control target
= control target key end

     0   :  { %s452_s0 = inlined_call_operand.vmem [shape: f32[512,36], index: 0, kind: input, shape index: {}]   ;;  %s453_s1 = inlined_call_operand.vmem [shape: f32[512,36], index: 1, kind: input, shape index: {}]   ;;  %s454_s2 = inlined_call_operand.vmem [shape: f32[512,36], index: 2, kind: output, shape index: {}]  }
   0x1   :  { %v3_v0 = vld [vmem:[%s452_s0] sm:$0xff]  ;;  %v212_v14 = vld [vmem:[%s452_s0 + $0x8] sm:$0xff]  ;;  %v227_v29 = vld [vmem:[%s452_s0 + $0x10] sm:$0xff] }
   0x2   :  { %v4_v1 = vld [vmem:[%s453_s1] sm:$0xff]  ;;  %v213_v15 = vld [vmem:[%s453_s1 + $0x8] sm:$0xff]  ;;  %v228_v31 = vld [vmem:[%s453_s1 + $0x10] sm:$0xff] }
   0x3   :  { %v200_v2 = vld [vmem:[%s452_s0 + $0x20] sm:$0xff]  ;;  %v7_v3 = vmul.f32 %v4_v1, %v3_v0  ;;  %v56_v17 = vmul.f32 %v213_v15, %v212_v14  ;;  %v215_v18 = vld [vmem:[%s452_s0 + $0x28] sm:$0xff]  ;;  %v230_v32 = vld [vmem:[%s452_s0 + $0x30] sm:$0xff]  ;;  %v106_v34 = vmul.f32 %v228_v31, %v227_v29 }
   0x4   :  { %v201_v4 = vld [vmem:[%s453_s1 + $0x20] sm:$0xff]  ;;  %v216_v19 = vld [vmem:[%s453_s1 + $0x28] sm:$0xff]  ;;  %v231_v33 = vld [vmem:[%s453_s1 + $0x30] sm:$0xff] }
   0x5   :  { %v203_v5 = vld [vmem:[%s452_s0 + $0x40] sm:$0xff]  ;;  %v16_v7 = vmul.f32 %v201_v4, %v200_v2  ;;  %9 = vst [vmem:[%s454_s2] sm:$0xff] %v7_v3  ;;  %v218_v20 = vld [vmem:[%s452_s0 + $0x48] sm:$0xff]  ;;  %v66_v21 = vmul.f32 %v216_v19, %v215_v18  ;;  %214 = vst [vmem:[%s454_s2 + $0x8] sm:$0xff] %v56_v17  ;;  %v116_v35 = vmul.f32 %v231_v33, %v230_v32 }
   0x6   :  { %v204_v6 = vld [vmem:[%s453_s1 + $0x40] sm:$0xff]  ;;  %v219_v22 = vld [vmem:[%s453_s1 + $0x48] sm:$0xff]  ;;  %v233_v36 = vld [vmem:[%s452_s0 + $0x50] sm:$0xff]  ;;  %229 = vst [vmem:[%s454_s2 + $0x10] sm:$0xff] %v106_v34 }
   0x7   :  { %v26_v8 = vmul.f32 %v204_v6, %v203_v5  ;;  %v206_v9 = vld [vmem:[%s452_s0 + $0x60] sm:$0xff]  ;;  %202 = vst [vmem:[%s454_s2 + $0x20] sm:$0xff] %v16_v7  ;;  %v221_v23 = vld [vmem:[%s452_s0 + $0x68] sm:$0xff]  ;;  %v76_v25 = vmul.f32 %v219_v22, %v218_v20  ;;  %217 = vst [vmem:[%s454_s2 + $0x28] sm:$0xff] %v66_v21 }
   0x8   :  { %v207_v10 = vld [vmem:[%s453_s1 + $0x60] sm:$0xff]  ;;  %v222_v24 = vld [vmem:[%s453_s1 + $0x68] sm:$0xff]  ;;  %v234_v37 = vld [vmem:[%s453_s1 + $0x50] sm:$0xff]  ;;  %232 = vst [vmem:[%s454_s2 + $0x30] sm:$0xff] %v116_v35 }
   0x9   :  { %v209_v11 = vld [vmem:[%s452_s0 + $0x80] sm:$0xff]  ;;  %v36_v12 = vmul.f32 %v207_v10, %v206_v9  ;;  %205 = vst [vmem:[%s454_s2 + $0x40] sm:$0xff] %v26_v8  ;;  %v86_v26 = vmul.f32 %v222_v24, %v221_v23  ;;  %v224_v27 = vld [vmem:[%s452_s0 + $0x88] sm:$0xff]  ;;  %220 = vst [vmem:[%s454_s2 + $0x48] sm:$0xff] %v76_v25  ;;  %v126_v39 = vmul.f32 %v234_v37, %v233_v36 }
   0xa   :  { %v210_v13 = vld [vmem:[%s453_s1 + $0x80] sm:$0xff]  ;;  %v225_v28 = vld [vmem:[%s453_s1 + $0x88] sm:$0xff]  ;;  %v236_v38 = vld [vmem:[%s452_s0 + $0x70] sm:$0xff] }
   0xb   :  { %v46_v16 = vmul.f32 %v210_v13, %v209_v11  ;;  %208 = vst [vmem:[%s454_s2 + $0x60] sm:$0xff] %v36_v12  ;;  %v96_v30 = vmul.f32 %v225_v28, %v224_v27  ;;  %223 = vst [vmem:[%s454_s2 + $0x68] sm:$0xff] %v86_v26  ;;  %v237_v40 = vld [vmem:[%s453_s1 + $0x70] sm:$0xff]  ;;  %v242_v45 = vld [vmem:[%s452_s0 + $0x18] sm:$0xff] }
   0xc   :  { %v239_v41 = vld [vmem:[%s452_s0 + $0x90] sm:$0xff]  ;;  %v136_v43 = vmul.f32 %v237_v40, %v236_v38  ;;  %v243_v46 = vld [vmem:[%s453_s1 + $0x18] sm:$0xff]  ;;  %235 = vst [vmem:[%s454_s2 + $0x50] sm:$0xff] %v126_v39 }
   0xd   :  { %211 = vst [vmem:[%s454_s2 + $0x80] sm:$0xff] %v46_v16  ;;  %226 = vst [vmem:[%s454_s2 + $0x88] sm:$0xff] %v96_v30  ;;  %v240_v42 = vld [vmem:[%s453_s1 + $0x90] sm:$0xff]  ;;  %v245_v47 = vld [vmem:[%s452_s0 + $0x38] sm:$0xff]  ;;  %v156_v48 = vmul.f32 %v243_v46, %v242_v45 }
   0xe   :  { %v146_v44 = vmul.f32 %v240_v42, %v239_v41  ;;  %v246_v49 = vld [vmem:[%s453_s1 + $0x38] sm:$0xff]  ;;  %238 = vst [vmem:[%s454_s2 + $0x70] sm:$0xff] %v136_v43 }
   0xf   :  { %v248_v50 = vld [vmem:[%s452_s0 + $0x58] sm:$0xff]  ;;  %v166_v52 = vmul.f32 %v246_v49, %v245_v47  ;;  %244 = vst [vmem:[%s454_s2 + $0x18] sm:$0xff] %v156_v48 }
  0x10   :  { %v249_v51 = vld [vmem:[%s453_s1 + $0x58] sm:$0xff]  ;;  %241 = vst [vmem:[%s454_s2 + $0x90] sm:$0xff] %v146_v44 }
  0x11   :  { %v176_v53 = vmul.f32 %v249_v51, %v248_v50  ;;  %v251_v54 = vld [vmem:[%s452_s0 + $0x78] sm:$0xff]  ;;  %247 = vst [vmem:[%s454_s2 + $0x38] sm:$0xff] %v166_v52 }
  0x12   :  { %v252_v55 = vld [vmem:[%s453_s1 + $0x78] sm:$0xff] }
  0x13   :  { %v254_v56 = vld [vmem:[%s452_s0 + $0x98] sm:$0xff]  ;;  %v186_v57 = vmul.f32 %v252_v55, %v251_v54  ;;  %250 = vst [vmem:[%s454_s2 + $0x58] sm:$0xff] %v176_v53 }
  0x14   :  { %v255_v58 = vld [vmem:[%s453_s1 + $0x98] sm:$0xff] }
  0x15   :  { %v196_v59 = vmul.f32 %v255_v58, %v254_v56  ;;  %253 = vst [vmem:[%s454_s2 + $0x78] sm:$0xff] %v186_v57 }
  0x17   :  { %256 = vst [vmem:[%s454_s2 + $0x98] sm:$0xff] %v196_v59 }

// kernel: deformable_conv2d_forward.3
= control target key start
LH: loop header
LB: loop body
LE: loop exit
PB: predicated region body
PF: predicated region fallthrough
CT: control target
= control target key end

     0   :  { %s783_s12 = smov 0   ;;  %s918_s0 = inlined_call_operand.vmem [shape: bf16[512,36], index: 0, kind: input, shape index: {}]   ;;  %s919_s1 = inlined_call_operand.vmem [shape: bf16[36,128], index: 1, kind: input, shape index: {}]   ;;  %s920_s2 = inlined_call_operand.vmem [shape: f32[1,128], index: 2, kind: input, shape index: {}]   ;;  %s921_s3 = inlined_call_operand.vmem [shape: f32[512,128], index: 3, kind: output, shape index: {}]  }
   0x1 LB: > { %s616_s13 = sadd.s32 4294967295, %s761_s12   ;;  %p620_p0 = scmp.ge.s32.totalorder %s761_s12, 1  ;;  %s761_s12 = sphi %s783_s12, %s13_s12  }
   0x2   : > { %p138_p1 = scmp.lt.s32.totalorder %s761_s12, 3 }
   0x4   : > { %p139_p2 = pnand %p620_p0, %p138_p1 }
   0x5   : > { %v736_v0 = vld [vmem:[%s919_s1] sm:$0xff] (!%p139_p2)   ;;  %v737_v1 = vld [vmem:[%s919_s1 + $0x8] sm:$0xff] (!%p139_p2)   ;;  %s621_s18 = sshll.u32 (!%p139_p2), %s616_s13, 5  ;;  %v738_v2 = vld [vmem:[%s919_s1 + $0x10] ss:$0 sps:$4 sm:$0x33] (!%p139_p2)  }
   0x6   : > { %142 = sbr.rel (%p139_p2) target bundleno = 261 (0x105), region = 32  ;;  %682 = vmatprep.subr.bf16.mxu0 (!%p139_p2), %v736_v0  ;;  %720 = vmatprep.subr.bf16.mxu1 (!%p139_p2), %v736_v0  ;;  %p163_p3 = scmp.lt.s32.totalorder (!%p139_p2), %s621_s18, 63  ;;  %vm363_vm0 = vcmask (!%p139_p2), 1041408   ;;  %vm314_vm1 = vcmask (!%p139_p2), 293888   ;;  %v844_v20 = vld [vmem:[%s920_s2] ss:$0 sm:$0xff] (!%p139_p2) }
   0x7   : > { %683 = vmatpush3.bf16.msra.mxu0 (!%p139_p2), %v736_v0  ;;  %723 = vmatpush3.bf16.msra.mxu1 (!%p139_p2), %v736_v0  ;;  %v365_v3 = vsel (!%p139_p2), %vm363_vm0, %v738_v2, 0 }
   0x8   : > { %684 = vmatprep.subr.bf16.mxu0 (!%p139_p2), %v737_v1  ;;  %721 = vmatprep.subr.bf16.mxu1 (!%p139_p2), %v737_v1 }
   0xb   : > { %685 = vmatpush3.bf16.msra.mxu0 (!%p139_p2), %v737_v1  ;;  %724 = vmatpush3.bf16.msra.mxu1 (!%p139_p2), %v737_v1 }
   0xc   : > { %726 = vmatprep.subr.msk.bf16.mxu0 (!%p139_p2), %vm363_vm0, %v738_v2  ;;  %727 = vmatprep.subr.msk.bf16.mxu1 (!%p139_p2), %vm363_vm0, %v738_v2 }
   0xd   : > { %s923_s18 = smov (!%p163_p3, %s621_s18), 63 }
   0xe   : > { %s622_s21 = sshll.u32 %s923_s18, 2  ;;  %s624_s25 = sshll.u32 %s923_s18, 3 }
   0xf   : > { %s806_s24 = scalar_lea.vmem %s918_s0, %s622_s21  ;;  %687 = vmatpush3.bf16.msra.mxu0 %v365_v3  ;;  %725 = vmatpush3.bf16.msra.mxu1 %v365_v3  ;;  %s849_s30 = scalar_lea.vmem %s921_s3, %s624_s25 }
  0x10   : > { %v739_v4 = vld [vmem:[%s806_s24] sm:$0xff]   ;;  %v741_v6 = vld [vmem:[%s806_s24 + $0x8] sm:$0xff]   ;;  %v743_v8 = vld [vmem:[%s806_s24 + $0x10] sm:$0xff]  }
  0x11   : > { %v740_v5 = vld [vmem:[%s806_s24 + $0x40] sm:$0xff]   ;;  %688 = vmatprep.mubr.msk.bf16.mxu0 %vm314_vm1, %v739_v4  ;;  %v742_v7 = vld [vmem:[%s806_s24 + $0x48] sm:$0xff]   ;;  %v744_v9 = vld [vmem:[%s806_s24 + $0x50] sm:$0xff]  }
  0x12   : > { %704 = vmatprep.mubr.msk.bf16.mxu1 %vm314_vm1, %v740_v5  ;;  %689 = vmatmul.mubr.msk.bf16.vlgmr.msra.gmra.mrb[0].mxu0 %vm314_vm1, %v741_v6  ;;  %v745_v10 = vld [vmem:[%s806_s24 + $0x18] sm:$0xff]   ;;  %v747_v12 = vld [vmem:[%s806_s24 + $0x20] sm:$0xff]   ;;  %v749_v14 = vld [vmem:[%s806_s24 + $0x28] sm:$0xff]  }
  0x13   : > { %705 = vmatmul.mubr.msk.bf16.vlgmr.msra.gmra.mrb[0].mxu1 %vm314_vm1, %v742_v7  ;;  %692 = vmatprep.mubr.msk.bf16.mxu0 %vm314_vm1, %v743_v8  ;;  %v746_v11 = vld [vmem:[%s806_s24 + $0x58] sm:$0xff]   ;;  %v748_v13 = vld [vmem:[%s806_s24 + $0x60] sm:$0xff]   ;;  %v750_v15 = vld [vmem:[%s806_s24 + $0x68] sm:$0xff]  }
  0x14   : > { %708 = vmatprep.mubr.msk.bf16.mxu1 %vm314_vm1, %v744_v9  ;;  %v751_v16 = vld [vmem:[%s806_s24 + $0x30] sm:$0xff]   ;;  %v753_v18 = vld [vmem:[%s806_s24 + $0x38] sm:$0xff]  }
  0x15   : > { %v752_v17 = vld [vmem:[%s806_s24 + $0x70] sm:$0xff]   ;;  %v754_v19 = vld [vmem:[%s806_s24 + $0x78] sm:$0xff]  }
  0x1a   : > { %693 = vmatmul.mubr.msk.bf16.gmra.mrb[4].mxu0 %vm314_vm1, %v745_v10 }
  0x1b   : > { %709 = vmatmul.mubr.msk.bf16.gmra.mrb[4].mxu1 %vm314_vm1, %v746_v11  ;;  %696 = vmatprep.mubr.msk.bf16.mxu0 %vm314_vm1, %v747_v12 }
  0x1c   : > { %712 = vmatprep.mubr.msk.bf16.mxu1 %vm314_vm1, %v748_v13 }
  0x22   : > { %697 = vmatmul.mubr.msk.bf16.gmra.mrb[8].mxu0 %vm314_vm1, %v749_v14 }
  0x23   : > { %713 = vmatmul.mubr.msk.bf16.gmra.mrb[8].mxu1 %vm314_vm1, %v750_v15  ;;  %700 = vmatprep.mubr.msk.bf16.mxu0 %vm314_vm1, %v751_v16 }
  0x24   : > { %716 = vmatprep.mubr.msk.bf16.mxu1 %vm314_vm1, %v752_v17 }
  0x2a   : > { %701 = vmatmul.mubr.msk.bf16.gmra.mrb[12].mxu0 %vm314_vm1, %v753_v18 }
  0x2b   : > { %717 = vmatmul.mubr.msk.bf16.gmra.mrb[12].mxu1 %vm314_vm1, %v754_v19 }
  0xe5   : > { %v690_v21 = vpop.f32.mrb[0].mxu0 }
  0xe6   : > { %v706_v22 = vpop.f32.mrb[0].mxu1  ;;  %v410_v23 = vadd.f32 %v690_v21, %v844_v20  ;;  %v401_v25 = vpop.f32.mrb[1].mxu0 }
  0xe7   : > { %v474_v24 = vadd.f32 %v706_v22, %v844_v20  ;;  %v465_v26 = vpop.f32.mrb[1].mxu1  ;;  %v402_v27 = vadd.f32 %v844_v20, %v401_v25  ;;  %v691_v29 = vpop.f32.mrb[2].mxu0 }
  0xe8   : > { %v466_v28 = vadd.f32 %v844_v20, %v465_v26  ;;  %v707_v30 = vpop.f32.mrb[2].mxu1  ;;  %530 = vst [vmem:[%s849_s30 + $0x10] sm:$0xff] %v410_v23  ;;  %v413_v31 = vadd.f32 %v691_v29, %v844_v20  ;;  %v404_v33 = vpop.f32.mrb[3].mxu0 }
  0xe9   : > { %546 = vst [vmem:[%s849_s30 + $0x90] sm:$0xff] %v474_v24  ;;  %v477_v32 = vadd.f32 %v707_v30, %v844_v20  ;;  %v468_v34 = vpop.f32.mrb[3].mxu1  ;;  %528 = vst [vmem:[%s849_s30] sm:$0xff] %v402_v27  ;;  %v405_v35 = vadd.f32 %v844_v20, %v404_v33 }
  0xea   : > { %544 = vst [vmem:[%s849_s30 + $0x80] sm:$0xff] %v466_v28  ;;  %v469_v36 = vadd.f32 %v844_v20, %v468_v34  ;;  %531 = vst [vmem:[%s849_s30 + $0x18] sm:$0xff] %v413_v31 }
  0xeb   : > { %547 = vst [vmem:[%s849_s30 + $0x98] sm:$0xff] %v477_v32  ;;  %529 = vst [vmem:[%s849_s30 + $0x8] sm:$0xff] %v405_v35 }
  0xec   : > { %545 = vst [vmem:[%s849_s30 + $0x88] sm:$0xff] %v469_v36 }
  0xed   : > { %v694_v37 = vpop.f32.mrb[4].mxu0 }
  0xee   : > { %v710_v38 = vpop.f32.mrb[4].mxu1  ;;  %v426_v39 = vadd.f32 %v694_v37, %v844_v20  ;;  %v417_v41 = vpop.f32.mrb[5].mxu0 }
  0xef   : > { %v490_v40 = vadd.f32 %v710_v38, %v844_v20  ;;  %v481_v42 = vpop.f32.mrb[5].mxu1  ;;  %v418_v43 = vadd.f32 %v844_v20, %v417_v41  ;;  %v695_v45 = vpop.f32.mrb[6].mxu0 }
  0xf0   : > { %v482_v44 = vadd.f32 %v844_v20, %v481_v42  ;;  %v711_v46 = vpop.f32.mrb[6].mxu1  ;;  %534 = vst [vmem:[%s849_s30 + $0x30] sm:$0xff] %v426_v39  ;;  %v429_v47 = vadd.f32 %v695_v45, %v844_v20  ;;  %v420_v49 = vpop.f32.mrb[7].mxu0 }
  0xf1   : > { %550 = vst [vmem:[%s849_s30 + $0xb0] sm:$0xff] %v490_v40  ;;  %v493_v48 = vadd.f32 %v711_v46, %v844_v20  ;;  %v484_v50 = vpop.f32.mrb[7].mxu1  ;;  %532 = vst [vmem:[%s849_s30 + $0x20] sm:$0xff] %v418_v43  ;;  %v421_v51 = vadd.f32 %v844_v20, %v420_v49 }
  0xf2   : > { %548 = vst [vmem:[%s849_s30 + $0xa0] sm:$0xff] %v482_v44  ;;  %v485_v52 = vadd.f32 %v844_v20, %v484_v50  ;;  %535 = vst [vmem:[%s849_s30 + $0x38] sm:$0xff] %v429_v47 }
  0xf3   : > { %551 = vst [vmem:[%s849_s30 + $0xb8] sm:$0xff] %v493_v48  ;;  %533 = vst [vmem:[%s849_s30 + $0x28] sm:$0xff] %v421_v51 }
  0xf4   : > { %549 = vst [vmem:[%s849_s30 + $0xa8] sm:$0xff] %v485_v52 }
  0xf5   : > { %v698_v53 = vpop.f32.mrb[8].mxu0 }
  0xf6   : > { %v714_v54 = vpop.f32.mrb[8].mxu1  ;;  %v442_v55 = vadd.f32 %v698_v53, %v844_v20  ;;  %v433_v57 = vpop.f32.mrb[9].mxu0 }
  0xf7   : > { %v506_v56 = vadd.f32 %v714_v54, %v844_v20  ;;  %v497_v58 = vpop.f32.mrb[9].mxu1  ;;  %v434_v59 = vadd.f32 %v844_v20, %v433_v57  ;;  %v699_v61 = vpop.f32.mrb[10].mxu0 }
  0xf8   : > { %v498_v60 = vadd.f32 %v844_v20, %v497_v58  ;;  %v715_v62 = vpop.f32.mrb[10].mxu1  ;;  %538 = vst [vmem:[%s849_s30 + $0x50] sm:$0xff] %v442_v55  ;;  %v445_v63 = vadd.f32 %v699_v61, %v844_v20  ;;  %v436_v1 = vpop.f32.mrb[11].mxu0 }
  0xf9   : > { %554 = vst [vmem:[%s849_s30 + $0xd0] sm:$0xff] %v506_v56  ;;  %v509_v0 = vadd.f32 %v715_v62, %v844_v20  ;;  %v500_v2 = vpop.f32.mrb[11].mxu1  ;;  %536 = vst [vmem:[%s849_s30 + $0x40] sm:$0xff] %v434_v59  ;;  %v437_v3 = vadd.f32 %v844_v20, %v436_v1 }
  0xfa   : > { %552 = vst [vmem:[%s849_s30 + $0xc0] sm:$0xff] %v498_v60  ;;  %v501_v4 = vadd.f32 %v844_v20, %v500_v2  ;;  %539 = vst [vmem:[%s849_s30 + $0x58] sm:$0xff] %v445_v63 }
  0xfb   : > { %555 = vst [vmem:[%s849_s30 + $0xd8] sm:$0xff] %v509_v0  ;;  %537 = vst [vmem:[%s849_s30 + $0x48] sm:$0xff] %v437_v3 }
  0xfc   : > { %553 = vst [vmem:[%s849_s30 + $0xc8] sm:$0xff] %v501_v4 }
  0xfd   : > { %v702_v5 = vpop.f32.mrb[12].mxu0 }
  0xfe   : > { %v718_v6 = vpop.f32.mrb[12].mxu1  ;;  %v458_v7 = vadd.f32 %v702_v5, %v844_v20  ;;  %v449_v9 = vpop.f32.mrb[13].mxu0 }
  0xff   : > { %v522_v8 = vadd.f32 %v718_v6, %v844_v20  ;;  %v513_v10 = vpop.f32.mrb[13].mxu1  ;;  %v450_v11 = vadd.f32 %v844_v20, %v449_v9  ;;  %v703_v13 = vpop.f32.mrb[14].mxu0 }
 0x100   : > { %v514_v12 = vadd.f32 %v844_v20, %v513_v10  ;;  %v719_v14 = vpop.f32.mrb[14].mxu1  ;;  %542 = vst [vmem:[%s849_s30 + $0x70] sm:$0xff] %v458_v7  ;;  %v461_v15 = vadd.f32 %v703_v13, %v844_v20  ;;  %v452_v17 = vpop.f32.mrb[15].mxu0 }
 0x101   : > { %558 = vst [vmem:[%s849_s30 + $0xf0] sm:$0xff] %v522_v8  ;;  %v525_v16 = vadd.f32 %v719_v14, %v844_v20  ;;  %v516_v18 = vpop.f32.mrb[15].mxu1  ;;  %540 = vst [vmem:[%s849_s30 + $0x60] sm:$0xff] %v450_v11  ;;  %v453_v19 = vadd.f32 %v844_v20, %v452_v17 }
 0x102   : > { %556 = vst [vmem:[%s849_s30 + $0xe0] sm:$0xff] %v514_v12  ;;  %v517_v21 = vadd.f32 %v844_v20, %v516_v18  ;;  %543 = vst [vmem:[%s849_s30 + $0x78] sm:$0xff] %v461_v15 }
 0x103   : > { %559 = vst [vmem:[%s849_s30 + $0xf8] sm:$0xff] %v525_v16  ;;  %541 = vst [vmem:[%s849_s30 + $0x68] sm:$0xff] %v453_v19 }
 0x104   : > { %557 = vst [vmem:[%s849_s30 + $0xe8] sm:$0xff] %v517_v21 }
 0x105 PF: > { %s13_s12 = sadd.s32 1, %s761_s12  }
 0x106   : > { %p10_p4 = scmp.ge.s32.totalorder %s13_s12, 4  }
 0x108   :  { %12 = sbr.rel (!%p10_p4) target bundleno = 1 (0x1), region = 62 }

</bundles_post_ra>
